<compile_context>
chip_gen: v5e
topology: v5e:2x2
jax: 0.10.0
libtpu: 0.0.40
codegen_flags: <defaults>
</compile_context>

<pallas_src>
import functools

import jax
import jax.numpy as jnp
from jax.experimental import pallas as pl
from jax.experimental.pallas import tpu as pltpu

_MIB = 1 << 20


# ---------------------------------------------------------------------------
# Kernels
# ---------------------------------------------------------------------------

def _tim_fused_kernel(rgb_ref, depth_ref, w1_ref, b1_ref, w2_ref, b2_ref,
                      alpha_ref, *out_refs, n_lanes, return_streams):
    """Single-pass SE + blend for one batch element. Feature blocks: (1, R, Lw)."""
    f32 = jnp.float32
    rgb = rgb_ref[...].astype(f32)       # (1, R, Lw)
    depth = depth_ref[...].astype(f32)   # (1, R, Lw)

    # Per-lane global average pool; the lane->channel folding (and the /G that
    # turns the per-lane mean into the per-channel mean) is baked into w1.
    pooled = jnp.concatenate(
        [jnp.mean(rgb, axis=1), jnp.mean(depth, axis=1)], axis=1)   # (1, 2*Lw)

    # Both streams' 1x1-conv MLPs as one block-diagonal matmul pair.
    hidden = jnp.dot(pooled, w1_ref[...], preferred_element_type=f32) + b1_ref[...]
    hidden = jnp.maximum(hidden, 0.0)                                # (1, 2*Cr)
    gates = jax.nn.sigmoid(
        jnp.dot(hidden, w2_ref[...], preferred_element_type=f32) + b2_ref[...])  # (1, 2*Lw)

    gate_r = gates[:, None, :n_lanes]    # (1, 1, Lw)
    gate_d = gates[:, None, n_lanes:]    # (1, 1, Lw)

    rgb_se = rgb * gate_r
    depth_se = depth * gate_d

    alpha = alpha_ref[0, 0]
    out = depth_se + alpha * (rgb_se - depth_se)   # == a*rgb' + (1-a)*depth'

    out_refs[0][...] = out.astype(out_refs[0].dtype)
    if return_streams:
        out_refs[1][...] = rgb_se.astype(out_refs[1].dtype)
        out_refs[2][...] = depth_se.astype(out_refs[2].dtype)


def _tim_apply_kernel(rgb_ref, depth_ref, gates_ref, alpha_ref, *out_refs,
                      n_lanes, return_streams):
    """Elementwise gate-apply + blend on a (1, tR, Lw) tile (gates precomputed)."""
    f32 = jnp.float32
    rgb = rgb_ref[...].astype(f32)       # (1, tR, Lw)
    depth = depth_ref[...].astype(f32)   # (1, tR, Lw)
    gates = gates_ref[...].astype(f32)   # (1, 1, 2*Lw)

    rgb_se = rgb * gates[..., :n_lanes]
    depth_se = depth * gates[..., n_lanes:]

    alpha = alpha_ref[0, 0]
    out = depth_se + alpha * (rgb_se - depth_se)

    out_refs[0][...] = out.astype(out_refs[0].dtype)
    if return_streams:
        out_refs[1][...] = rgb_se.astype(out_refs[1].dtype)
        out_refs[2][...] = depth_se.astype(out_refs[2].dtype)


# ---------------------------------------------------------------------------
# Wrapper helpers
# ---------------------------------------------------------------------------

def _lane_packing(S, C):
    """Group factor G so the packed lane width C*G is a multiple of 128."""
    if C % 128 == 0:
        return 1
    if 128 % C == 0 and S % (128 // C) == 0:
        return 128 // C
    return 1  # correct (but not lane-dense) fallback for odd channel counts


def _fold_se_weights(params, G):
    """Pre-transpose + lane-tile the SE weights and stack both streams
    block-diagonally so they share one matmul pair.

    Lane p of the packed layout holds channel p % C, hence:
      w1_cat[p, j] = W1[j, p % C] / G   (the /G converts per-lane mean -> GAP)
      w2_cat[j, p] = W2[p % C, j],  b2_cat[p] = b2[p % C].
    """
    f32 = jnp.float32

    def fold_w1(w1):   # (Cr, C) -> (Lw, Cr)
        return jnp.tile(jnp.transpose(w1).astype(f32), (G, 1)) / float(G)

    def fold_w2(w2):   # (C, Cr) -> (Cr, Lw)
        return jnp.tile(jnp.transpose(w2).astype(f32), (1, G))

    def fold_b2(b2):   # (1, C) -> (1, Lw)
        return jnp.tile(b2.astype(f32), (1, G))

    w1r, w1d = fold_w1(params["w1_rgb"]), fold_w1(params["w1_depth"])
    w2r, w2d = fold_w2(params["w2_rgb"]), fold_w2(params["w2_depth"])
    b2r, b2d = fold_b2(params["b2_rgb"]), fold_b2(params["b2_depth"])
    Lw, Cr = w1r.shape

    w1_cat = jnp.zeros((2 * Lw, 2 * Cr), f32)
    w1_cat = w1_cat.at[:Lw, :Cr].set(w1r).at[Lw:, Cr:].set(w1d)
    w2_cat = jnp.zeros((2 * Cr, 2 * Lw), f32)
    w2_cat = w2_cat.at[:Cr, :Lw].set(w2r).at[Cr:, Lw:].set(w2d)
    b1_cat = jnp.concatenate(
        [params["b1_rgb"].astype(f32), params["b1_depth"].astype(f32)], axis=1)
    b2_cat = jnp.concatenate([b2r, b2d], axis=1)
    return w1_cat, b1_cat, w2_cat, b2_cat


def _pick_row_tile(R, max_rows):
    """Largest row tile <= max_rows that divides R and keeps the (8,128) rule."""
    for t in range(min(R, max(max_rows, 1)), 0, -1):
        if R % t == 0 and (t % 8 == 0 or t == R):
            return t
    return R


# ---------------------------------------------------------------------------
# Forward
# ---------------------------------------------------------------------------

def tim_forward(rgb_nsc, depth_nsc, params, *, return_streams=True,
                out_dtype=None, vmem_budget_bytes=40 * _MIB):
    """TIM forward.  rgb_nsc / depth_nsc: (N, S, C) channel-last feature maps.

    Returns (out, rgb', depth') each (N, S, C) if return_streams, else just out.
    I/O may be bf16 (GAP / gate MLP / sigmoid run in f32); out_dtype defaults to
    the input dtype.
    """
    assert rgb_nsc.shape == depth_nsc.shape and rgb_nsc.dtype == depth_nsc.dtype
    N, S, C = rgb_nsc.shape
    in_dtype = rgb_nsc.dtype
    out_dtype = jnp.dtype(out_dtype or in_dtype)

    # Lane-dense repack: (N, S, C) -> (N, R, Lw), Lw = C*G multiple of 128.
    # NOTE: in a real network the packed layout should be threaded between
    # layers; here the (cheap, one-time) reshape lives in the wrapper.
    G = _lane_packing(S, C)
    Lw, R = C * G, S // G
    rgb_p = rgb_nsc.reshape(N, R, Lw)
    depth_p = depth_nsc.reshape(N, R, Lw)

    w1_cat, b1_cat, w2_cat, b2_cat = _fold_se_weights(params, G)
    two_cr = w1_cat.shape[1]
    alpha = params["alpha"].reshape(1, 1).astype(jnp.float32)

    n_out = 3 if return_streams else 1
    in_b = jnp.dtype(in_dtype).itemsize
    out_b = out_dtype.itemsize
    elem_bytes = 2 * in_b + n_out * out_b            # HBM bytes per element
    weight_bytes = 2 * 4 * (w1_cat.size + b1_cat.size + w2_cat.size + b2_cat.size)

    out_shapes = [jax.ShapeDtypeStruct((N, R, Lw), out_dtype) for _ in range(n_out)]
    cost = pl.CostEstimate(
        flops=int(5 * N * R * Lw),
        transcendentals=int(2 * N * Lw),
        bytes_accessed=int(N * R * Lw * elem_bytes + weight_bytes),
    )
    smem_spec = pl.BlockSpec(memory_space=pltpu.MemorySpace.SMEM)

    fused_block_bytes = 2 * R * Lw * elem_bytes      # double-buffered I/O tiles
    if fused_block_bytes + weight_bytes <= vmem_budget_bytes:
        # ---- single pass: GAP + gate MLP + apply + blend, grid=(N,).
        vmem_limit = int(min(max(32 * _MIB, fused_block_bytes + 8 * _MIB), 56 * _MIB))
        feat = lambda: pl.BlockSpec((1, R, Lw), lambda n: (n, 0, 0))
        grid_spec = pltpu.PrefetchScalarGridSpec(
            num_scalar_prefetch=0,
            grid=(N,),
            in_specs=[
                feat(), feat(),
                pl.BlockSpec((2 * Lw, two_cr), lambda n: (0, 0)),
                pl.BlockSpec((1, two_cr), lambda n: (0, 0)),
                pl.BlockSpec((two_cr, 2 * Lw), lambda n: (0, 0)),
                pl.BlockSpec((1, 2 * Lw), lambda n: (0, 0)),
                smem_spec,
            ],
            out_specs=[feat() for _ in range(n_out)],
        )
        kernel = functools.partial(_tim_fused_kernel, n_lanes=Lw,
                                   return_streams=return_streams)
        outs = pl.pallas_call(
            kernel,
            out_shape=out_shapes,
            grid_spec=grid_spec,
            compiler_params=pltpu.CompilerParams(
                dimension_semantics=("parallel",),
                vmem_limit_bytes=vmem_limit),
            cost_estimate=cost,
        )(rgb_p, depth_p, w1_cat, b1_cat, w2_cat, b2_cat, alpha)
    else:
        # ---- two passes: (1) gates via tiny GAP + MLP in plain JAX,
        #                  (2) spatially tiled elementwise apply/blend kernel.
        f32 = jnp.float32
        pooled = jnp.concatenate(
            [jnp.mean(rgb_p.astype(f32), axis=1),
             jnp.mean(depth_p.astype(f32), axis=1)], axis=1)           # (N, 2*Lw)
        hidden = jnp.maximum(pooled @ w1_cat + b1_cat, 0.0)            # (N, 2*Cr)
        gates = jax.nn.sigmoid(hidden @ w2_cat + b2_cat)               # (N, 2*Lw)
        gates3 = gates[:, None, :].astype(f32)                         # (N, 1, 2*Lw)

        per_row_bytes = 2 * Lw * elem_bytes
        max_rows = max(int(vmem_budget_bytes // per_row_bytes), 1)
        tR = _pick_row_tile(R, max_rows)
        vmem_limit = int(min(max(32 * _MIB, 2 * tR * Lw * elem_bytes + 8 * _MIB),
                             56 * _MIB))
        feat = lambda: pl.BlockSpec((1, tR, Lw), lambda n, t: (n, t, 0))
        grid_spec = pltpu.PrefetchScalarGridSpec(
            num_scalar_prefetch=0,
            grid=(N, R // tR),
            in_specs=[
                feat(), feat(),
                pl.BlockSpec((1, 1, 2 * Lw), lambda n, t: (n, 0, 0)),
                smem_spec,
            ],
            out_specs=[feat() for _ in range(n_out)],
        )
        kernel = functools.partial(_tim_apply_kernel, n_lanes=Lw,
                                   return_streams=return_streams)
        outs = pl.pallas_call(
            kernel,
            out_shape=out_shapes,
            grid_spec=grid_spec,
            compiler_params=pltpu.CompilerParams(
                dimension_semantics=("parallel", "parallel"),
                vmem_limit_bytes=vmem_limit),
            cost_estimate=cost,
        )(rgb_p, depth_p, gates3, alpha)

    outs = [o.reshape(N, S, C) for o in outs]
    if return_streams:
        return outs[0], outs[1], outs[2]
    return outs[0]


# ---------------------------------------------------------------------------
# Pure-JAX reference (mirrors the PyTorch module)
# ---------------------------------------------------------------------------

def tim_reference(rgb_nsc, depth_nsc, params):
    def se(x, w1, b1, w2, b2):
        pooled = jnp.mean(x, axis=1)                  # adaptive_avg_pool2d(x, 1)
        h = jnp.maximum(pooled @ w1.T + b1, 0.0)      # 1x1 conv + ReLU
        g = jax.nn.sigmoid(h @ w2.T + b2)             # 1x1 conv + Sigmoid
        return x * g[:, None, :]

    rgb_se = se(rgb_nsc, params["w1_rgb"], params["b1_rgb"],
                params["w2_rgb"], params["b2_rgb"])
    depth_se = se(depth_nsc, params["w1_depth"], params["b1_depth"],
                  params["w2_depth"], params["b2_depth"])
    a = params["alpha"].reshape(())
    return a * rgb_se + (1.0 - a) * depth_se, rgb_se, depth_se


if __name__ == "__main__":
    N, C, H, W = 2, 32, 16, 16
    reduction = 16
    Cr = C // reduction   # 2
    S = H * W             # 256

    key = jax.random.PRNGKey(0)
    keys = jax.random.split(key, 10)

    # Inputs (NCHW, as PyTorch) -> channel-last (N, S, C) kernel layout.
    rgb_nchw = jax.random.normal(keys[0], (N, C, H, W), dtype=jnp.float32)
    depth_nchw = jax.random.normal(keys[1], (N, C, H, W), dtype=jnp.float32)
    rgb_nsc = rgb_nchw.reshape(N, C, S).transpose(0, 2, 1)
    depth_nsc = depth_nchw.reshape(N, C, S).transpose(0, 2, 1)

    params = {
        "w1_rgb": 0.1 * jax.random.normal(keys[2], (Cr, C), dtype=jnp.float32),
        "b1_rgb": 0.01 * jax.random.normal(keys[3], (1, Cr), dtype=jnp.float32),
        "w2_rgb": 0.1 * jax.random.normal(keys[4], (C, Cr), dtype=jnp.float32),
        "b2_rgb": 0.01 * jax.random.normal(keys[5], (1, C), dtype=jnp.float32),
        "w1_depth": 0.1 * jax.random.normal(keys[6], (Cr, C), dtype=jnp.float32),
        "b1_depth": 0.01 * jax.random.normal(keys[7], (1, Cr), dtype=jnp.float32),
        "w2_depth": 0.1 * jax.random.normal(keys[8], (C, Cr), dtype=jnp.float32),
        "b2_depth": 0.01 * jax.random.normal(keys[9], (1, C), dtype=jnp.float32),
        "alpha": jnp.full((1, 1), 0.5, dtype=jnp.float32),
    }

    out_ref, rgb_ref_, depth_ref_ = tim_reference(rgb_nsc, depth_nsc, params)

    # 1) single-pass (fused) lane-dense path, f32, full module outputs.
    out, rgb_se, depth_se = tim_forward(rgb_nsc, depth_nsc, params)
    jax.block_until_ready((out, rgb_se, depth_se))
    assert jnp.allclose(out, out_ref, atol=1e-5, rtol=1e-5)
    assert jnp.allclose(rgb_se, rgb_ref_, atol=1e-5, rtol=1e-5)
    assert jnp.allclose(depth_se, depth_ref_, atol=1e-5, rtol=1e-5)

    # 2) blended-output-only path (2 reads + 1 write of HBM traffic).
    out_only = tim_forward(rgb_nsc, depth_nsc, params, return_streams=False)
    jax.block_until_ready(out_only)
    assert jnp.allclose(out_only, out_ref, atol=1e-5, rtol=1e-5)

    # 3) VMEM-bounded two-pass path (forced with a tiny budget -> spatial tiling).
    out2, rgb2, depth2 = tim_forward(rgb_nsc, depth_nsc, params,
                                     vmem_budget_bytes=64 * 1024)
    jax.block_until_ready((out2, rgb2, depth2))
    assert jnp.allclose(out2, out_ref, atol=1e-5, rtol=1e-5)
    assert jnp.allclose(rgb2, rgb_ref_, atol=1e-5, rtol=1e-5)
    assert jnp.allclose(depth2, depth_ref_, atol=1e-5, rtol=1e-5)

    # 4) bf16 I/O (halves HBM traffic; GAP / MLP / sigmoid stay f32).
    rgb_bf = rgb_nsc.astype(jnp.bfloat16)
    depth_bf = depth_nsc.astype(jnp.bfloat16)
    out_bf = tim_forward(rgb_bf, depth_bf, params, return_streams=False)
    jax.block_until_ready(out_bf)
    out_ref_bf, _, _ = tim_reference(rgb_bf.astype(jnp.float32),
                                     depth_bf.astype(jnp.float32), params)
    assert jnp.allclose(out_bf.astype(jnp.float32), out_ref_bf, atol=2e-2, rtol=2e-2)

    print("KERNEL_OK")
</pallas_src>

<mosaic_0001>
module attributes {stable_mosaic.version = 11 : i64} {
  func.func @_tim_fused_kernel(%arg0: i32, %arg1: memref<1x64x128xf32, #tpu.memory_space<vmem>>, %arg2: memref<1x64x128xf32, #tpu.memory_space<vmem>>, %arg3: memref<256x4xf32, #tpu.memory_space<vmem>>, %arg4: memref<1x4xf32, #tpu.memory_space<vmem>>, %arg5: memref<4x256xf32, #tpu.memory_space<vmem>>, %arg6: memref<1x256xf32, #tpu.memory_space<vmem>>, %arg7: memref<1x1xf32, #tpu.memory_space<smem>>, %arg8: memref<1x64x128xf32, #tpu.memory_space<vmem>>, %arg9: memref<1x64x128xf32, #tpu.memory_space<vmem>>, %arg10: memref<1x64x128xf32, #tpu.memory_space<vmem>>) attributes {dimension_semantics = [#tpu.dimension_semantics<parallel>], iteration_bounds = array<i64: 2>, scalar_prefetch = 0 : i64, scratch_operands = 0 : i64, tpu.core_type = #tpu.core_type<tc>, window_params = [{transform_indices = @transform_0, window_bounds = array<i64: 1, 64, 128>}, {transform_indices = @transform_1, window_bounds = array<i64: 1, 64, 128>}, {pipeline_mode = #tpu.pipeline_mode<synchronous>, transform_indices = @transform_2, window_bounds = array<i64: 256, 4>}, {pipeline_mode = #tpu.pipeline_mode<synchronous>, transform_indices = @transform_3, window_bounds = array<i64: 1, 4>}, {pipeline_mode = #tpu.pipeline_mode<synchronous>, transform_indices = @transform_4, window_bounds = array<i64: 4, 256>}, {pipeline_mode = #tpu.pipeline_mode<synchronous>, transform_indices = @transform_5, window_bounds = array<i64: 1, 256>}, {transform_indices = @transform_6, window_bounds = array<i64: 1, 1>}, {transform_indices = @transform_7, window_bounds = array<i64: 1, 64, 128>}, {transform_indices = @transform_8, window_bounds = array<i64: 1, 64, 128>}, {transform_indices = @transform_9, window_bounds = array<i64: 1, 64, 128>}]} {
    %c0 = arith.constant 0 : index
    %c0_0 = arith.constant 0 : index
    %c0_1 = arith.constant 0 : index
    %0 = vector.load %arg1[%c0, %c0_0, %c0_1] : memref<1x64x128xf32, #tpu.memory_space<vmem>>, vector<1x64x128xf32>
    %c0_2 = arith.constant 0 : index
    %c0_3 = arith.constant 0 : index
    %c0_4 = arith.constant 0 : index
    %1 = vector.load %arg2[%c0_2, %c0_3, %c0_4] : memref<1x64x128xf32, #tpu.memory_space<vmem>>, vector<1x64x128xf32>
    %cst = arith.constant dense<0.000000e+00> : vector<1x128xf32>
    %2 = vector.multi_reduction <add>, %0, %cst [1] : vector<1x64x128xf32> to vector<1x128xf32>
    %cst_5 = arith.constant 6.400000e+01 : f32
    %3 = vector.broadcast %cst_5 : f32 to vector<1x128xf32>
    %4 = arith.divf %2, %3 : vector<1x128xf32>
    %cst_6 = arith.constant dense<0.000000e+00> : vector<1x128xf32>
    %5 = vector.multi_reduction <add>, %1, %cst_6 [1] : vector<1x64x128xf32> to vector<1x128xf32>
    %cst_7 = arith.constant 6.400000e+01 : f32
    %6 = vector.broadcast %cst_7 : f32 to vector<1x128xf32>
    %7 = arith.divf %5, %6 : vector<1x128xf32>
    %8 = tpu.concatenate %4, %7 in 1 : vector<1x128xf32>, vector<1x128xf32> -> vector<1x256xf32>
    %c0_8 = arith.constant 0 : index
    %c0_9 = arith.constant 0 : index
    %9 = vector.load %arg3[%c0_8, %c0_9] : memref<256x4xf32, #tpu.memory_space<vmem>>, vector<256x4xf32>
    %cst_10 = arith.constant dense<0.000000e+00> : vector<1x4xf32>
    %10 = tpu.matmul %8, %9, %cst_10 {dimension_numbers = #tpu.dot_dimension_numbers<[1], [0], [0], [1], [0, 0, 1, 1], [], []>} : vector<1x256xf32>, vector<256x4xf32>, vector<1x4xf32> -> vector<1x4xf32>
    %c0_11 = arith.constant 0 : index
    %c0_12 = arith.constant 0 : index
    %11 = vector.load %arg4[%c0_11, %c0_12] : memref<1x4xf32, #tpu.memory_space<vmem>>, vector<1x4xf32>
    %12 = arith.addf %10, %11 : vector<1x4xf32>
    %cst_13 = arith.constant 0.000000e+00 : f32
    %13 = vector.broadcast %cst_13 : f32 to vector<1x4xf32>
    %14 = arith.maximumf %12, %13 : vector<1x4xf32>
    %c0_14 = arith.constant 0 : index
    %c0_15 = arith.constant 0 : index
    %15 = vector.load %arg5[%c0_14, %c0_15] : memref<4x256xf32, #tpu.memory_space<vmem>>, vector<4x256xf32>
    %cst_16 = arith.constant dense<0.000000e+00> : vector<1x256xf32>
    %16 = tpu.matmul %14, %15, %cst_16 {dimension_numbers = #tpu.dot_dimension_numbers<[1], [0], [0], [1], [0, 0, 1, 1], [], []>} : vector<1x4xf32>, vector<4x256xf32>, vector<1x256xf32> -> vector<1x256xf32>
    %c0_17 = arith.constant 0 : index
    %c0_18 = arith.constant 0 : index
    %17 = vector.load %arg6[%c0_17, %c0_18] : memref<1x256xf32, #tpu.memory_space<vmem>>, vector<1x256xf32>
    %18 = arith.addf %16, %17 : vector<1x256xf32>
    %19 = arith.negf %18 : vector<1x256xf32>
    %20 = math.exp %19 : vector<1x256xf32>
    %cst_19 = arith.constant 1.000000e+00 : f32
    %21 = vector.broadcast %cst_19 : f32 to vector<1x256xf32>
    %22 = arith.addf %21, %20 : vector<1x256xf32>
    %23 = arith.divf %21, %22 : vector<1x256xf32>
    %24 = vector.extract_strided_slice %23 {offsets = [0, 0], sizes = [1, 128], strides = [1, 1]} : vector<1x256xf32> to vector<1x128xf32>
    %25 = vector.shape_cast %24 : vector<1x128xf32> to vector<1x1x128xf32>
    %26 = vector.extract_strided_slice %23 {offsets = [0, 128], sizes = [1, 128], strides = [1, 1]} : vector<1x256xf32> to vector<1x128xf32>
    %27 = vector.shape_cast %26 : vector<1x128xf32> to vector<1x1x128xf32>
    %28 = vector.broadcast %25 : vector<1x1x128xf32> to vector<1x64x128xf32>
    %29 = arith.mulf %0, %28 : vector<1x64x128xf32>
    %30 = vector.broadcast %27 : vector<1x1x128xf32> to vector<1x64x128xf32>
    %31 = arith.mulf %1, %30 : vector<1x64x128xf32>
    %c0_20 = arith.constant 0 : index
    %c0_21 = arith.constant 0 : index
    %32 = memref.load %arg7[%c0_20, %c0_21] : memref<1x1xf32, #tpu.memory_space<smem>>
    %33 = arith.subf %29, %31 : vector<1x64x128xf32>
    %34 = vector.broadcast %32 : f32 to vector<1x64x128xf32>
    %35 = arith.mulf %34, %33 : vector<1x64x128xf32>
    %36 = arith.addf %31, %35 : vector<1x64x128xf32>
    %c0_22 = arith.constant 0 : index
    %c0_23 = arith.constant 0 : index
    %c0_24 = arith.constant 0 : index
    %37 = vector.load %arg8[%c0_22, %c0_23, %c0_24] : memref<1x64x128xf32, #tpu.memory_space<vmem>>, vector<1x64x128xf32>
    tpu.vector_store %arg8[%c0_22, %c0_23, %c0_24], %36 {strides = array<i32>} : memref<1x64x128xf32, #tpu.memory_space<vmem>>, vector<1x64x128xf32>,
    %c0_25 = arith.constant 0 : index
    %c0_26 = arith.constant 0 : index
    %c0_27 = arith.constant 0 : index
    %38 = vector.load %arg9[%c0_25, %c0_26, %c0_27] : memref<1x64x128xf32, #tpu.memory_space<vmem>>, vector<1x64x128xf32>
    tpu.vector_store %arg9[%c0_25, %c0_26, %c0_27], %29 {strides = array<i32>} : memref<1x64x128xf32, #tpu.memory_space<vmem>>, vector<1x64x128xf32>,
    %c0_28 = arith.constant 0 : index
    %c0_29 = arith.constant 0 : index
    %c0_30 = arith.constant 0 : index
    %39 = vector.load %arg10[%c0_28, %c0_29, %c0_30] : memref<1x64x128xf32, #tpu.memory_space<vmem>>, vector<1x64x128xf32>
    tpu.vector_store %arg10[%c0_28, %c0_29, %c0_30], %31 {strides = array<i32>} : memref<1x64x128xf32, #tpu.memory_space<vmem>>, vector<1x64x128xf32>,
    return
  }
  func.func @transform_0(%arg0: i32) -> (i32, i32, i32) {
    %c0_i32 = arith.constant 0 : i32
    %c0_i32_0 = arith.constant 0 : i32
    %c0_i32_1 = arith.constant 0 : i32
    return %arg0, %c0_i32, %c0_i32_0 : i32, i32, i32
  }
  func.func @transform_1(%arg0: i32) -> (i32, i32, i32) {
    %c0_i32 = arith.constant 0 : i32
    %c0_i32_0 = arith.constant 0 : i32
    %c0_i32_1 = arith.constant 0 : i32
    return %arg0, %c0_i32, %c0_i32_0 : i32, i32, i32
  }
  func.func @transform_2(%arg0: i32) -> (i32, i32) {
    %c0_i32 = arith.constant 0 : i32
    %c0_i32_0 = arith.constant 0 : i32
    %c0_i32_1 = arith.constant 0 : i32
    return %c0_i32, %c0_i32_0 : i32, i32
  }
  func.func @transform_3(%arg0: i32) -> (i32, i32) {
    %c0_i32 = arith.constant 0 : i32
    %c0_i32_0 = arith.constant 0 : i32
    %c0_i32_1 = arith.constant 0 : i32
    return %c0_i32, %c0_i32_0 : i32, i32
  }
  func.func @transform_4(%arg0: i32) -> (i32, i32) {
    %c0_i32 = arith.constant 0 : i32
    %c0_i32_0 = arith.constant 0 : i32
    %c0_i32_1 = arith.constant 0 : i32
    return %c0_i32, %c0_i32_0 : i32, i32
  }
  func.func @transform_5(%arg0: i32) -> (i32, i32) {
    %c0_i32 = arith.constant 0 : i32
    %c0_i32_0 = arith.constant 0 : i32
    %c0_i32_1 = arith.constant 0 : i32
    return %c0_i32, %c0_i32_0 : i32, i32
  }
  func.func @transform_6(%arg0: i32) -> (i32, i32) {
    %c0_i32 = arith.constant 0 : i32
    %c0_i32_0 = arith.constant 0 : i32
    %c0_i32_1 = arith.constant 0 : i32
    return %c0_i32, %c0_i32_0 : i32, i32
  }
  func.func @transform_7(%arg0: i32) -> (i32, i32, i32) {
    %c0_i32 = arith.constant 0 : i32
    %c0_i32_0 = arith.constant 0 : i32
    %c0_i32_1 = arith.constant 0 : i32
    return %arg0, %c0_i32, %c0_i32_0 : i32, i32, i32
  }
  func.func @transform_8(%arg0: i32) -> (i32, i32, i32) {
    %c0_i32 = arith.constant 0 : i32
    %c0_i32_0 = arith.constant 0 : i32
    %c0_i32_1 = arith.constant 0 : i32
    return %arg0, %c0_i32, %c0_i32_0 : i32, i32, i32
  }
  func.func @transform_9(%arg0: i32) -> (i32, i32, i32) {
    %c0_i32 = arith.constant 0 : i32
    %c0_i32_0 = arith.constant 0 : i32
    %c0_i32_1 = arith.constant 0 : i32
    return %arg0, %c0_i32, %c0_i32_0 : i32, i32, i32
  }
}

</mosaic_0001>

<bundles_post_ra>
// kernel: tpu_custom_call.1
= control target key start
LH: loop header
LB: loop body
LE: loop exit
PB: predicated region body
PF: predicated region fallthrough
CT: control target
= control target key end

     0   :  { %s1624_s0 = inlined_call_operand.vmem [shape: f32[2,64,128], index: 0, kind: input, shape index: {}]   ;;  %s1625_s1 = inlined_call_operand.vmem [shape: f32[2,64,128], index: 1, kind: input, shape index: {}]   ;;  %s1626_s2 = inlined_call_operand.vmem [shape: f32[256,4], index: 2, kind: input, shape index: {}]   ;;  %s1627_s3 = inlined_call_operand.hbm [shape: f32[1,4], index: 3, kind: input, shape index: {}]   ;;  %s1628_s4 = inlined_call_operand.vmem [shape: f32[4,256], index: 4, kind: input, shape index: {}]   ;;  %s1629_s5 = inlined_call_operand.vmem [shape: f32[1,256], index: 5, kind: input, shape index: {}]   ;;  %s1630_s6 = inlined_call_operand.<no memory space> [shape: f32[1,1], index: 6, kind: input, shape index: {}]   ;;  %s1631_s7 = inlined_call_operand.hbm [shape: f32[2,64,128], index: 7, kind: output, shape index: {0}]   ;;  %s1632_s8 = inlined_call_operand.hbm [shape: f32[2,64,128], index: 8, kind: output, shape index: {1}]   ;;  %s1633_s9 = inlined_call_operand.hbm [shape: f32[2,64,128], index: 9, kind: output, shape index: {2}]  }
   0x1   :  { %1636 = sst [smem:[#allocation13_spill]] %s1624_s0 }
   0x2   :  { %1637 = sst [smem:[#allocation14_spill]] %s1625_s1 }
   0x3   :  { %1638 = sst [smem:[#allocation15_spill]] %s1626_s2 }
   0x4   :  { %15 = sst [smem:[#allocation2]] %s1630_s6 }
   0x5   :  { %16 = vsyncpa [#allocation4], 0 }
   0x6   :  { %17 = vsyncpa [#allocation5], 0 }
   0x7   :  { %19 = vsyncpa [#allocation5 + $0x1], 0 }
   0x8   :  { %20 = vsyncpa [#allocation8], 0 }
   0x9   :  { %22 = vsyncpa [#allocation8 + $0x1], 0  ;;  %s1208_s11 = smov 0   ;;  %s1210_s12 = smov 0  }
   0xa   :  { %s1212_s13 = smov 0   ;;  %s1214_s14 = smov 0  }
   0xb LB: > { %s1229_s6 = sadd.s32 4294967295, %s1149_s14   ;;  %s1634_s15 = sadd.s32 4294967294, %s1149_s14   ;;  %s1149_s14 = sphi %s1214_s14, %s1649_s14   ;;  %s1145_s13 = sphi %s1212_s13, %s1648_s13   ;;  %s1141_s12 = sphi %s1210_s12, %s1647_s12   ;;  %s1137_s11 = sphi %s1208_s11, %s1646_s11  }
   0xc   : > { %s1233_s16 = sadd.s32 1, %s1149_s14   ;;  %s192_s17 = sadd.s32 1, %s1145_s13 }
   0xd   : > { %s189_s18 = ssub.s32 %s1149_s14, %s1233_s16  ;;  %p202_p0 = scmp.ne.s32.totalorder %s1145_s13, %s1141_s12 }
   0xe   : > { %p190_p1 = scmp.eq.s32.totalorder %s189_s18, 0  ;;  %p203_p2 = scmp.eq.s32.totalorder %s1229_s6, 1 }
   0xf   : > { %p208_p3 = scmp.ne.s32.totalorder %s1141_s12, %s1137_s11  ;;  %p209_p4 = scmp.eq.s32.totalorder %s1634_s15, 1 }
  0x10   : > { %s1246_s19 = scalar_select %p190_p1, %s1145_s13, %s192_s17  }
  0x11   : > { %p1248_p5 = por %p203_p2, %p202_p0  ;;  %p1252_p6 = por %p209_p4, %p208_p3 }
  0x12   : > { %p886_p7 = scmp.ge.s32.totalorder %s1149_s14, 1  ;;  %p268_p8 = scmp.lt.s32.totalorder %s1149_s14, 3 }
  0x13   : > { %p944_p9 = scmp.eq.s32.totalorder %s1229_s6, 0  ;;  %s283_s24 = sshll.u32 %s1627_s3, 4  ;;  %s284_s24 = int_to_ptr.hbm [resolvable:$true] %s283_s24 }
  0x14   : > { %p269_p10 = pnand %p886_p7, %p268_p8  ;;  %s1151_s25 = smov [#allocation3]  }
  0x15   : > { %s285_s26 = sshll.u32 %s1151_s25, 4  ;;  %s286_s26 = int_to_ptr.vmem [resolvable:$true] %s285_s26 }
  0x16   : > { %p930_p11 = pneg %p269_p10  ;;  %323 = sbr.rel (%p269_p10) target bundleno = 419 (0x1a3), region = 48 }
  0x18   : > { %p931_p12 = pnand %p944_p9, %p930_p11 }
  0x1a   : > { %933 = dma.hbm_to_vmem [thread:$0]  (!%p931_p12), %s284_s24, 16, %s286_s26, [#allocation4]  }
  0x1b   : > { %1124 = dma.done.wait (%p944_p9), [#allocation4], 16  }
  0x1c   : > { %1126 = vsyncadd (%p944_p9), [#allocation4], 4294967280  ;;  %p375_p13 = scmp.lt.s32.totalorder %s1229_s6, 1  ;;  %s1641_s2 = sld [smem:[#allocation15_spill]]  ;;  %v1152_v13 = vmov 64.0   ;;  %vm525_vm1 = vcmask 1043456  }
  0x1d   : > { %s1642_s0 = sld [smem:[#allocation13_spill]]  ;;  %983 = vrcp.f32 %v1152_v13  ;;  %vm521_vm2 = vcmask 31744   ;;  %s1635_s25 = sand.u32 1, %s1141_s12  }
  0x1e   : > { %s1273_s18 = scalar_select %p375_p13, %s1229_s6, 1 }
  0x1f   : > { %s1643_s1 = sld [smem:[#allocation14_spill]]  ;;  %s1453_s26 = sshll.u32 %s1635_s25, 6 }
  0x20   : > { %s915_s17 = sshll.u32 %s1273_s18, 6  ;;  %s626_s27 = sld [smem:[#allocation2]] }
  0x21   : > { %s1472_s30 = scalar_lea.vmem [#allocation9], %s1453_s26  ;;  %s1486_s18 = sshll.u32 %s1229_s6, 6 }
  0x22   : > { %v451_v0 = vld [vmem:[%s1641_s2 + $0x78] sm:$0xff]  ;;  %v450_v1 = vld [vmem:[%s1641_s2 + $0x70] sm:$0xff]  ;;  %v449_v4 = vld [vmem:[%s1641_s2 + $0x68] sm:$0xff]  ;;  %s698_s10 = scalar_lea.hbm %s1631_s7, %s1486_s18 }
  0x23   : > { %v467_v2 = vld [vmem:[%s1641_s2 + $0xf8] sm:$0xff]  ;;  %469 = vmatpush.msra.mxu0 %v451_v0  ;;  %v466_v3 = vld [vmem:[%s1641_s2 + $0xf0] sm:$0xff]  ;;  %v465_v5 = vld [vmem:[%s1641_s2 + $0xe8] sm:$0xff]  ;;  %s1300_s28 = scalar_lea.vmem %s1642_s0, %s915_s17  ;;  %v1360_v30 = vpop.eup %983 }
  0x24   : > { %489 = vmatpush.msra.mxu1 %v467_v2  ;;  %v448_v6 = vld [vmem:[%s1641_s2 + $0x60] sm:$0xff]  ;;  %v447_v8 = vld [vmem:[%s1641_s2 + $0x58] sm:$0xff]  ;;  %v446_v10 = vld [vmem:[%s1641_s2 + $0x50] sm:$0xff]  ;;  %v415_v42 = vmul.f32 64.0, %v1360_v30  ;;  %vm419_vm0 = vweird.f32 %v1360_v30 }
  0x25   : > { %470 = vmatpush.msra.mxu0 %v450_v1  ;;  %v464_v7 = vld [vmem:[%s1641_s2 + $0xe0] sm:$0xff]  ;;  %v463_v9 = vld [vmem:[%s1641_s2 + $0xd8] sm:$0xff]  ;;  %v462_v11 = vld [vmem:[%s1641_s2 + $0xd0] sm:$0xff]  ;;  %s1323_s29 = scalar_lea.vmem %s1643_s1, %s915_s17  ;;  %s681_s17 = sand.u32 1, %s1229_s6  }
  0x26   : > { %490 = vmatpush.msra.mxu1 %v466_v3  ;;  %v445_v12 = vld [vmem:[%s1641_s2 + $0x48] sm:$0xff]  ;;  %v1315_v15 = vld [vmem:[%s1300_s28] sm:$0xff]  ;;  %v1326_v17 = vld [vmem:[%s1300_s28 + $0x10] sm:$0xff]  ;;  %v416_v54 = vsub.f32 1.0, %v415_v42  ;;  %s1531_s22 = scalar_lea.sflag [#allocation8], %s681_s17 }
  0x27   : > { %471 = vmatpush.msra.mxu0 %v449_v4  ;;  %v461_v14 = vld [vmem:[%s1641_s2 + $0xc8] sm:$0xff]  ;;  %v444_v19 = vld [vmem:[%s1641_s2 + $0x40] sm:$0xff]  ;;  %v1337_v21 = vld [vmem:[%s1300_s28 + $0x18] sm:$0xff] }
  0x28   : > { %491 = vmatpush.msra.mxu1 %v465_v5  ;;  %v1318_v16 = vld [vmem:[%s1300_s28 + $0x8] sm:$0xff]  ;;  %v460_v20 = vld [vmem:[%s1641_s2 + $0xc0] sm:$0xff]  ;;  %v443_v22 = vld [vmem:[%s1641_s2 + $0x38] sm:$0xff]  ;;  %v417_v0 = vmul.f32 %v1360_v30, %v416_v54 }
  0x29   : > { %472 = vmatpush.msra.mxu0 %v448_v6  ;;  %v401_v18 = vadd.f32 %v1318_v16, %v1315_v15  ;;  %v1344_v24 = vld [vmem:[%s1323_s29] sm:$0xff]  ;;  %v1347_v25 = vld [vmem:[%s1323_s29 + $0x8] sm:$0xff]  ;;  %v459_v26 = vld [vmem:[%s1641_s2 + $0xb8] sm:$0xff] }
  0x2a   : > { %492 = vmatpush.msra.mxu1 %v464_v7  ;;  %v1353_v27 = vld [vmem:[%s1300_s28 + $0x20] sm:$0xff]  ;;  %v1356_v28 = vld [vmem:[%s1323_s29 + $0x10] sm:$0xff]  ;;  %v422_v29 = vadd.f32 %v1347_v25, %v1344_v24  ;;  %v1364_v32 = vld [vmem:[%s1323_s29 + $0x18] sm:$0xff]  ;;  %v418_v7 = vadd.f32 %v1360_v30, %v417_v0 }
  0x2b   : > { %473 = vmatpush.msra.mxu0 %v447_v8  ;;  %v402_v23 = vadd.f32 %v401_v18, %v1326_v17  ;;  %v442_v33 = vld [vmem:[%s1641_s2 + $0x30] sm:$0xff]  ;;  %v1373_v35 = vld [vmem:[%s1300_s28 + $0x28] sm:$0xff]  ;;  %v1378_v38 = vld [vmem:[%s1323_s29 + $0x20] sm:$0xff] }
  0x2c   : > { %493 = vmatpush.msra.mxu1 %v463_v9  ;;  %v458_v34 = vld [vmem:[%s1641_s2 + $0xb0] sm:$0xff]  ;;  %v423_v36 = vadd.f32 %v422_v29, %v1356_v28  ;;  %v441_v39 = vld [vmem:[%s1641_s2 + $0x28] sm:$0xff]  ;;  %v440_v46 = vld [vmem:[%s1641_s2 + $0x20] sm:$0xff] }
  0x2d   : > { %474 = vmatpush.msra.mxu0 %v446_v10  ;;  %v403_v31 = vadd.f32 %v402_v23, %v1337_v21  ;;  %v457_v40 = vld [vmem:[%s1641_s2 + $0xa8] sm:$0xff]  ;;  %v1387_v41 = vld [vmem:[%s1300_s28 + $0x30] sm:$0xff]  ;;  %v456_v47 = vld [vmem:[%s1641_s2 + $0xa0] sm:$0xff] }
  0x2e   : > { %494 = vmatpush.msra.mxu1 %v462_v11  ;;  %v424_v43 = vadd.f32 %v423_v36, %v1364_v32  ;;  %v1393_v45 = vld [vmem:[%s1323_s29 + $0x28] sm:$0xff]  ;;  %v1402_v48 = vld [vmem:[%s1300_s28 + $0x38] sm:$0xff]  ;;  %v1407_v51 = vld [vmem:[%s1323_s29 + $0x30] sm:$0xff]  ;;  %s715_s28 = scalar_lea.hbm %s1632_s8, %s1486_s18 }
  0x2f   : > { %475 = vmatpush.msra.mxu0 %v445_v12  ;;  %v404_v37 = vadd.f32 %v403_v31, %v1353_v27  ;;  %v439_v52 = vld [vmem:[%s1641_s2 + $0x18] sm:$0xff]  ;;  %v438_v58 = vld [vmem:[%s1641_s2 + $0x10] sm:$0xff]  ;;  %v437_v62 = vld [vmem:[%s1641_s2 + $0x8] sm:$0xff]  ;;  %v420_v12 = vsel %vm419_vm0, %v1360_v30, %v418_v7  ;;  %s1515_s24 = sshll.u32 %s715_s28, 4  ;;  %s719_s24 = int_to_ptr.hbm [resolvable:$true] %s1515_s24 }
  0x30   : > { %495 = vmatpush.msra.mxu1 %v461_v14  ;;  %v425_v49 = vadd.f32 %v424_v43, %v1378_v38  ;;  %v455_v53 = vld [vmem:[%s1641_s2 + $0x98] sm:$0xff]  ;;  %v454_v59 = vld [vmem:[%s1641_s2 + $0x90] sm:$0xff]  ;;  %v453_v63 = vld [vmem:[%s1641_s2 + $0x88] sm:$0xff]  ;;  %s1037_s28 = sshra.s32 %s719_s24, 4  ;;  %s1038_s28 = int_to_ptr.hbm [resolvable:$true] %s1037_s28 }
  0x31   : > { %476 = vmatpush.msra.mxu0 %v444_v19  ;;  %v405_v44 = vadd.f32 %v404_v37, %v1373_v35  ;;  %v1418_v57 = vld [vmem:[%s1323_s29 + $0x38] sm:$0xff]  ;;  %v436_v3 = vld [vmem:[%s1641_s2] sm:$0xff]  ;;  %v468_v31 = vld [vmem:[#allocation3] sm:$0x1]  ;;  %s1461_s29 = scalar_lea.vmem [#allocation7], %s1453_s26  ;;  %s1039_s15 = scalar_lea.hbm %s1038_s28, 64 }
  0x32   : > { %496 = vmatpush.msra.mxu1 %v460_v20  ;;  %v426_v55 = vadd.f32 %v425_v49, %v1393_v45  ;;  %v452_v4 = vld [vmem:[%s1641_s2 + $0x80] sm:$0xff]  ;;  %s716_s23 = sshll.u32 %s1461_s29, 4  ;;  %p1040_p0 = scmp.ne.s32.totalorder %s1038_s28, %s1039_s15  ;;  %s1522_s23 = int_to_ptr.vmem [resolvable:$true] %s716_s23 }
  0x33   : > { %477 = vmatpush.msra.mxu0 %v443_v22  ;;  %v406_v50 = vadd.f32 %v405_v44, %v1387_v41  ;;  %v510_v23 = vld [vmem:[%s1628_s4] sm:$0xff]  ;;  %p1044_p3 = scmp.lt.s32.totalorder %s1038_s28, %s1632_s8 }
  0x34   : > { %497 = vmatpush.msra.mxu1 %v459_v26  ;;  %v427_v60 = vadd.f32 %v426_v55, %v1407_v51  ;;  %513 = vst [vmem:[#allocation1] ss:$2 sm:$0xff] %v510_v23  ;;  %p1041_p1 = pnand %p1040_p0, %p1248_p5 }
  0x35   : > { %478 = vmatpush.msra.mxu0 %v442_v33  ;;  %v407_v56 = vadd.f32 %v406_v50, %v1402_v48 }
  0x36   : > { %498 = vmatpush.msra.mxu1 %v458_v34  ;;  %v428_v1 = vadd.f32 %v427_v60, %v1418_v57  ;;  %p1042_p2 = pneg %p1041_p1 }
  0x37   : > { %479 = vmatpush.msra.mxu0 %v441_v39  ;;  %v408_v61 = vrot.slane %v407_v56, 4  ;;  %v511_v39 = vld [vmem:[%s1629_s5] sm:$0x3] }
  0x38   : > { %499 = vmatpush.msra.mxu1 %v457_v40  ;;  %v429_v5 = vrot.slane %v428_v1, 4  ;;  %v517_v40 = vperm.slane %v511_v39, 0  ;;  %v518_v42 = vperm.slane %v511_v39, 1 }
  0x39   : > { %480 = vmatpush.msra.mxu0 %v440_v46  ;;  %v409_v2 = vadd.f32 %v408_v61, %v407_v56 }
  0x3a   : > { %500 = vmatpush.msra.mxu1 %v456_v47  ;;  %v430_v8 = vadd.f32 %v429_v5, %v428_v1 }
  0x3b   : > { %481 = vmatpush.msra.mxu0 %v439_v52  ;;  %v410_v6 = vrot.slane %v409_v2, 2  ;;  %v514_v26 = vld.sshfl [vmem:[#allocation1] sm:$0xff pattern:$0x75316420] }
  0x3c   : > { %501 = vmatpush.msra.mxu1 %v455_v53  ;;  %v431_v10 = vrot.slane %v430_v8, 2  ;;  %898 = vmatpush.msk.msra.mxu2 %vm525_vm1, %v514_v26  ;;  %v515_v29 = vld.sshfl [vmem:[#allocation1 + $0x8] sm:$0xff pattern:$0x75316420] }
  0x3d   : > { %482 = vmatpush.msra.mxu0 %v438_v58  ;;  %v411_v9 = vadd.f32 %v410_v6, %v409_v2  ;;  %900 = vmatpush.msk.msra.mxu3 %vm525_vm1, %v515_v29 }
  0x3e   : > { %502 = vmatpush.msra.mxu1 %v454_v59  ;;  %v432_v13 = vadd.f32 %v431_v10, %v430_v8 }
  0x3f   : > { %483 = vmatpush.msra.mxu0 %v437_v62  ;;  %v412_v11 = vrot.slane %v411_v9, 1 }
  0x40   : > { %503 = vmatpush.msra.mxu1 %v453_v63  ;;  %v433_v18 = vrot.slane %v432_v13, 1 }
  0x41   : > { %484 = vmatpush.msra.mxu0 %v436_v3  ;;  %v413_v14 = vadd.f32 %v412_v11, %v411_v9 }
  0x42   : > { %504 = vmatpush.msra.mxu1 %v452_v4  ;;  %v434_v20 = vadd.f32 %v433_v18, %v432_v13 }
  0x43   : > { %v421_v19 = vmul.f32 %v420_v12, %v413_v14 }
  0x44   : > { %v435_v22 = vmul.f32 %v434_v20, %v420_v12 }
  0x45   : > { %485 = vmatmul.f32.vlgmr.msra.gmra.mxu0 %v421_v19 }
  0x46   : > { %505 = vmatmul.f32.vlgmr.msra.gmra.mxu1 %v435_v22 }
  0xc2   : > { %v486_v30 = vpop.f32.mrf.mxu0 }
  0xc3   : > { %v487_v33 = vadd.f32 %v486_v30, %v468_v31  ;;  %v506_v34 = vpop.f32.mrf.mxu1 }
  0xc5   : > { %v507_v36 = vadd.f32 %v506_v34, %v487_v33 }
  0xc7   : > { %v509_v37 = vmax.f32 %v507_v36, 0.0 }
  0xc9   : > { %899 = vmatmul.msk.f32.vlgmr.msra.gmra.mxu2 %vm521_vm2, %v509_v37  ;;  %901 = vmatmul.msk.f32.vlgmr.msra.gmra.mxu3 %vm521_vm2, %v509_v37 }
 0x14c   : > { %v547_v43 = vpop.f32.mrf.mxu2  ;;  %v567_v44 = vpop.f32.mrf.mxu3 }
 0x14d   : > { %v548_v46 = vadd.f32 %v547_v43, %v517_v40  ;;  %v568_v47 = vadd.f32 %v567_v44, %v518_v42 }
 0x14f   : > { %v902_v49 = vmul.f32 -1.442695, %v548_v46  ;;  %v903_v50 = vmul.f32 -1.442695, %v568_v47 }
 0x151   : > { %985 = vpow2.f32 %v902_v49 }
 0x152   : > { %987 = vpow2.f32 %v903_v50 }
 0x157   : > { %v986_v52 = vpop.eup %985 }
 0x158   : > { %v988_v53 = vpop.eup %987  ;;  %v576_v54 = vadd.f32 1.0, %v986_v52 }
 0x159   : > { %v577_v55 = vadd.f32 1.0, %v988_v53 }
 0x15a   : > { %989 = vrcp.f32 %v576_v54  ;;  %v589_v62 = vand.u32 2147483648, %v576_v54  ;;  %v587_v1 = vand.u32 2147483647, %v576_v54  ;;  %vm583_vm5 = vweird.f32 %v576_v54 }
 0x15b   : > { %991 = vrcp.f32 %v577_v55  ;;  %v604_v2 = vand.u32 2147483648, %v577_v55  ;;  %v602_v4 = vand.u32 2147483647, %v577_v55  ;;  %vm598_vm7 = vweird.f32 %v577_v55 }
 0x15c   : > { %v590_v6 = vor.u32 1.1754944e-38, %v589_v62  ;;  %vm588_vm8 = vcmp.eq.f32.partialorder %v587_v1, 8.507059e+37 }
 0x15d   : > { %v605_v9 = vor.u32 1.1754944e-38, %v604_v2  ;;  %vm603_vm10 = vcmp.eq.f32.partialorder %v602_v4, 8.507059e+37 }
 0x160   : > { %v990_v56 = vpop.eup %989 }
 0x161   : > { %v992_v58 = vpop.eup %991  ;;  %v579_v59 = vmul.f32 %v990_v56, %v576_v54  ;;  %vm584_vm3 = vweird.f32 %v990_v56 }
 0x162   : > { %v594_v60 = vmul.f32 %v992_v58, %v577_v55  ;;  %vm599_vm4 = vweird.f32 %v992_v58  ;;  %vm585_vm6 = vmor %vm583_vm5, %vm584_vm3 }
 0x163   : > { %v580_v61 = vsub.f32 1.0, %v579_v59  ;;  %vm600_vm9 = vmor %vm598_vm7, %vm599_vm4 }
 0x164   : > { %v595_v63 = vsub.f32 1.0, %v594_v60 }
 0x165   : > { %v581_v0 = vmul.f32 %v990_v56, %v580_v61 }
 0x166   : > { %v596_v3 = vmul.f32 %v992_v58, %v595_v63 }
 0x167   : > { %v582_v5 = vadd.f32 %v990_v56, %v581_v0 }
 0x168   : > { %v597_v7 = vadd.f32 %v992_v58, %v596_v3 }
 0x169   : > { %v586_v8 = vsel %vm585_vm6, %v990_v56, %v582_v5 }
 0x16a   : > { %v591_v10 = vsel %vm588_vm8, %v590_v6, %v586_v8  ;;  %v601_v11 = vsel %vm600_vm9, %v992_v58, %v597_v7 }
 0x16b   : > { %v608_v12 = vperm.slane %v591_v10, 0  ;;  %v606_v13 = vsel %vm603_vm10, %v605_v9, %v601_v11 }
 0x16c   : > { %v617_v14 = vperm.slane %v606_v13, 0 }
 0x16d   : > { %v609_v18 = vmul.f32 %v608_v12, %v1315_v15  ;;  %v610_v19 = vmul.f32 %v608_v12, %v1318_v16  ;;  %v611_v16 = vmul.f32 %v608_v12, %v1326_v17  ;;  %v615_v29 = vmul.f32 %v608_v12, %v1387_v41 }
 0x16e   : > { %v618_v20 = vmul.f32 %v617_v14, %v1344_v24  ;;  %v619_v22 = vmul.f32 %v617_v14, %v1347_v25  ;;  %v620_v23 = vmul.f32 %v617_v14, %v1356_v28  ;;  %v1465_v26 = vmul.f32 %v617_v14, %v1364_v32 }
 0x16f   : > { %660 = vst [vmem:[%s1461_s29] sm:$0xff] %v609_v18  ;;  %v1469_v15 = vmul.f32 %v617_v14, %v1378_v38  ;;  %v1477_v24 = vmul.f32 %v617_v14, %v1393_v45  ;;  %v612_v25 = vmul.f32 %v608_v12, %v1337_v21  ;;  %v1482_v28 = vmul.f32 %v617_v14, %v1407_v51 }
 0x170   : > { %661 = vst [vmem:[%s1461_s29 + $0x8] sm:$0xff] %v610_v19  ;;  %v613_v32 = vmul.f32 %v608_v12, %v1353_v27  ;;  %v1490_v17 = vmul.f32 %v617_v14, %v1418_v57  ;;  %v627_v38 = vsub.f32 %v609_v18, %v618_v20  ;;  %v614_v21 = vmul.f32 %v608_v12, %v1373_v35 }
 0x171   : > { %668 = vst [vmem:[%s1472_s30] sm:$0xff] %v618_v20  ;;  %v628_v45 = vsub.f32 %v610_v19, %v619_v22  ;;  %v635_v51 = vstv %s626_s27  ;;  %v629_v31 = vsub.f32 %v611_v16, %v620_v23  ;;  %v616_v27 = vmul.f32 %v608_v12, %v1402_v48 }
 0x172   : > { %669 = vst [vmem:[%s1472_s30 + $0x8] sm:$0xff] %v619_v22  ;;  %v630_v35 = vsub.f32 %v612_v25, %v1465_v26  ;;  %v631_v57 = vsub.f32 %v613_v32, %v1469_v15  ;;  %v636_v41 = vmul.f32 %v635_v51, %v627_v38  ;;  %v632_v30 = vsub.f32 %v614_v21, %v1477_v24 }
 0x173   : > { %670 = vst [vmem:[%s1472_s30 + $0x10] sm:$0xff] %v620_v23  ;;  %v637_v48 = vmul.f32 %v635_v51, %v628_v45  ;;  %v633_v33 = vsub.f32 %v615_v29, %v1482_v28  ;;  %v638_v34 = vmul.f32 %v635_v51, %v629_v31  ;;  %v634_v36 = vsub.f32 %v616_v27, %v1490_v17 }
 0x174   : > { %671 = vst [vmem:[%s1472_s30 + $0x18] sm:$0xff] %v1465_v26  ;;  %v639_v37 = vmul.f32 %v635_v51, %v630_v35  ;;  %v640_v39 = vmul.f32 %v635_v51, %v631_v57  ;;  %v644_v40 = vadd.f32 %v636_v41, %v618_v20  ;;  %v641_v42 = vmul.f32 %v635_v51, %v632_v30 }
 0x175   : > { %672 = vst [vmem:[%s1472_s30 + $0x20] sm:$0xff] %v1469_v15  ;;  %v645_v43 = vadd.f32 %v637_v48, %v619_v22  ;;  %v642_v44 = vmul.f32 %v635_v51, %v633_v33  ;;  %v646_v46 = vadd.f32 %v638_v34, %v620_v23 }
 0x176   : > { %673 = vst [vmem:[%s1472_s30 + $0x28] sm:$0xff] %v1477_v24 }
 0x177   : > { %674 = vst [vmem:[%s1472_s30 + $0x30] sm:$0xff] %v1482_v28 }
 0x178   : > { %675 = vst [vmem:[%s1472_s30 + $0x38] sm:$0xff] %v1490_v17 }
 0x179   : > { %662 = vst [vmem:[%s1461_s29 + $0x10] sm:$0xff] %v611_v16 }
 0x17a   : > { %663 = vst [vmem:[%s1461_s29 + $0x18] sm:$0xff] %v612_v25 }
 0x17b   : > { %664 = vst [vmem:[%s1461_s29 + $0x20] sm:$0xff] %v613_v32 }
 0x17c   : > { %665 = vst [vmem:[%s1461_s29 + $0x28] sm:$0xff] %v614_v21 }
 0x17d   : > { %666 = vst [vmem:[%s1461_s29 + $0x30] sm:$0xff] %v615_v29 }
 0x17e   : > { %667 = vst [vmem:[%s1461_s29 + $0x38] sm:$0xff] %v616_v27  ;;  %s1043_s29 = scalar_lea.hbm %s1632_s8, 128 }
 0x17f   : > { %p1045_p4 = scmp.lt.s32.totalorder %s1043_s29, %s1039_s15 }
 0x181   : > { %p1046_p7 = por %p1045_p4, %p1044_p3 }
 0x183   : > { %p1047_p8 = pnand %p1046_p7, %p1042_p2 }
 0x185   : > { %1050 = shalt.err (!%p1047_p8)
}
 0x186   : > { %s1153_s17 = smov 128   ;;  %s1154_s6 = smov 8   ;;  %v643_v47 = vmul.f32 %v635_v51, %v634_v36  ;;  %v647_v49 = vadd.f32 %v639_v37, %v1465_v26  ;;  %v648_v50 = vadd.f32 %v640_v39, %v1469_v15  ;;  %v649_v52 = vadd.f32 %v641_v42, %v1477_v24 }
 0x187   : > { %925 = dma.vmem_to_hbm [thread:$0]  (%p1248_p5), %s1522_s23, 1024, %s719_s24, %s1531_s22, %s1153_s17, %s1153_s17, %s1154_s6   ;;  %v650_v53 = vadd.f32 %v642_v44, %v1482_v28 }
 0x188   : > { %s732_s2 = scalar_lea.hbm %s1633_s9, %s1486_s18  ;;  %s360_s15 = scalar_lea.vmem [#allocation6], %s1453_s26  ;;  %v651_v54 = vadd.f32 %v643_v47, %v1490_v17 }
 0x189   : > { %652 = vst [vmem:[%s360_s15] sm:$0xff] %v644_v40  ;;  %s699_s25 = sshll.u32 %s360_s15, 4  ;;  %s1561_s23 = sshll.u32 %s698_s10, 4  ;;  %s700_s25 = int_to_ptr.vmem [resolvable:$true] %s699_s25  ;;  %s702_s23 = int_to_ptr.hbm [resolvable:$true] %s1561_s23 }
 0x18a   : > { %653 = vst [vmem:[%s360_s15 + $0x8] sm:$0xff] %v645_v43  ;;  %s1563_s24 = sshll.u32 %s732_s2, 4  ;;  %s733_s26 = sshll.u32 %s1472_s30, 4  ;;  %s736_s24 = int_to_ptr.hbm [resolvable:$true] %s1563_s24  ;;  %s1569_s26 = int_to_ptr.vmem [resolvable:$true] %s733_s26 }
 0x18b   : > { %654 = vst [vmem:[%s360_s15 + $0x10] sm:$0xff] %v646_v46  ;;  %s1644_s18 = sand.u32 1, %s1141_s12   ;;  %s1065_s10 = sshra.s32 %s702_s23, 4  ;;  %s1066_s10 = int_to_ptr.hbm [resolvable:$true] %s1065_s10 }
 0x18c   : > { %655 = vst [vmem:[%s360_s15 + $0x18] sm:$0xff] %v647_v49  ;;  %s677_s27 = scalar_lea.sflag [#allocation5], %s1644_s18  ;;  %s1067_s28 = scalar_lea.hbm %s1066_s10, 64 }
 0x18d   : > { %656 = vst [vmem:[%s360_s15 + $0x20] sm:$0xff] %v648_v50  ;;  %p1068_p9 = scmp.ne.s32.totalorder %s1066_s10, %s1067_s28  ;;  %s1071_s0 = scalar_lea.hbm %s1631_s7, 128 }
 0x18e   : > { %657 = vst [vmem:[%s360_s15 + $0x28] sm:$0xff] %v649_v52  ;;  %p1072_p12 = scmp.lt.s32.totalorder %s1066_s10, %s1631_s7  ;;  %p1073_p13 = scmp.lt.s32.totalorder %s1071_s0, %s1067_s28 }
 0x18f   : > { %658 = vst [vmem:[%s360_s15 + $0x30] sm:$0xff] %v650_v53  ;;  %p1069_p10 = pnand %p1068_p9, %p1248_p5 }
 0x190   : > { %659 = vst [vmem:[%s360_s15 + $0x38] sm:$0xff] %v651_v54  ;;  %p1074_p0 = por %p1073_p13, %p1072_p12 }
 0x191   : > { %p1070_p11 = pneg %p1069_p10 }
 0x193   : > { %p1075_p1 = pnand %p1074_p0, %p1070_p11 }
 0x195   : > { %1078 = shalt.err (!%p1075_p1)
}
 0x196   : > { %924 = dma.vmem_to_hbm [thread:$0]  (%p1248_p5), %s700_s25, 1024, %s702_s23, %s677_s27, %s1153_s17, %s1153_s17, %s1154_s6  }
 0x197   : > { %s1093_s15 = sshra.s32 %s736_s24, 4  ;;  %s1099_s29 = scalar_lea.hbm %s1633_s9, 128  ;;  %s1094_s15 = int_to_ptr.hbm [resolvable:$true] %s1093_s15 }
 0x198   : > { %s1095_s18 = scalar_lea.hbm %s1094_s15, 64  ;;  %p1100_p7 = scmp.lt.s32.totalorder %s1094_s15, %s1633_s9 }
 0x199   : > { %p1096_p2 = scmp.ne.s32.totalorder %s1094_s15, %s1095_s18  ;;  %p1101_p8 = scmp.lt.s32.totalorder %s1099_s29, %s1095_s18 }
 0x19b   : > { %p1097_p3 = pnand %p1096_p2, %p1248_p5  ;;  %p1102_p9 = por %p1101_p8, %p1100_p7 }
 0x19d   : > { %p1098_p4 = pneg %p1097_p3 }
 0x19f   : > { %p1103_p10 = pnand %p1102_p9, %p1098_p4 }
 0x1a1   : > { %1106 = shalt.err (!%p1103_p10)
}
 0x1a2   : > { %926 = dma.vmem_to_hbm [thread:$0]  (%p1248_p5), %s1569_s26, 1024, %s736_s24, %s1531_s22, %s1153_s17, %s1153_s17, %s1154_s6  }
 0x1a3 PF: > { %p946_p11 = scmp.ge.s32.totalorder %s1149_s14, 2  ;;  %s750_s25 = sand.u32 1, %s1137_s11  }
 0x1a4   : > { %s751_s23 = scalar_lea.sflag [#allocation5], %s750_s25 }
 0x1a5   : > { %p935_p12 = pnand %p946_p11, %p1252_p6 }
 0x1a7   : > { %p936_p13 = pneg %p935_p12 }
 0x1a9   : > { %1128 = dma.done.wait (%p936_p13), %s751_s23, 1024  }
 0x1aa   : > { %1130 = vsyncadd (%p936_p13), %s751_s23, 4294966272  ;;  %s1645_s20 = sadd.s32 4294967294, %s1149_s14  }
 0x1ab   : > { %s760_s27 = sand.u32 1, %s1645_s20  }
 0x1ac   : > { %s761_s1 = scalar_lea.sflag [#allocation8], %s760_s27 }
 0x1ad   : > { %1132 = dma.done.wait (%p936_p13), %s761_s1, 2048  }
 0x1ae   : > { %1134 = vsyncadd (%p936_p13), %s761_s1, 4294965248  ;;  %p25_p5 = scmp.ge.s32.totalorder %s1233_s16, 4   ;;  %s1646_s11 = smov %s1141_s12 }
 0x1af   : > { %s1647_s12 = smov %s1145_s13  ;;  %s1648_s13 = smov %s1246_s19 }
 0x1b0   : > { %s1649_s14 = smov %s1233_s16  ;;  %27 = sbr.rel (!%p25_p5) target bundleno = 11 (0xb), region = 123 }
 0x1b5   :  { %777 = vsyncpa [#allocation4], 1 }
 0x1b6   :  { %779 = vsyncpa [#allocation4 + $0x1], 1 }
 0x1b7   :  { %780 = vsyncpa [#allocation5], 1 }
 0x1b8   :  { %782 = vsyncpa [#allocation5 + $0x1], 1 }
 0x1b9   :  { %783 = vsyncpa [#allocation8], 1 }
 0x1ba   :  { %785 = vsyncpa [#allocation8 + $0x1], 1 }

</bundles_post_ra>
